<compile_context>
chip_gen: v6e
topology: v6e:2x2x1
jax: 0.10.0
libtpu: 0.0.40
codegen_flags: <defaults>
</compile_context>

<pallas_src>
import math
from functools import partial

import jax
import jax.numpy as jnp
from jax import lax
from jax.experimental import pallas as pl
from jax.experimental.pallas import tpu as pltpu

STDDEV = 0.1

_LANES = 1024          # lane-dense row width (multiple of 128)
_MAX_TILE_ROWS = 512   # 512 x 1024 x 4B = 2 MiB f32 tile per buffer


def _hash32(v):
    """lowbias32-style avalanche hash on uint32 values (fallback path only)."""
    v = v ^ (v >> 16)
    v = v * jnp.uint32(0x7FEB352D)
    v = v ^ (v >> 15)
    v = v * jnp.uint32(0x846CA68B)
    v = v ^ (v >> 16)
    return v


def _bits_to_unit(bits_u32):
    """uint32 random bits -> float32 uniform in [0, 1) via mantissa trick."""
    mantissa = bits_u32 & jnp.uint32(0x007FFFFF)
    one_to_two = lax.bitcast_convert_type(
        mantissa | jnp.uint32(0x3F800000), jnp.float32)  # [1, 2)
    return one_to_two - jnp.float32(1.0)


def gaussian_noise_kernel(seed_ref, x_ref, o_ref, *, stddev, use_hw_prng):
    tm, tn = x_ref.shape
    half = tn // 2

    if use_hw_prng:
        # ---- hardware PRNG: one independent stream per grid step ----
        pltpu.prng_seed(seed_ref[0] + pl.program_id(0))
        raw1 = pltpu.prng_random_bits((tm, half))
        raw2 = pltpu.prng_random_bits((tm, half))
        bits1 = raw1 if raw1.dtype == jnp.uint32 else pltpu.bitcast(raw1, jnp.uint32)
        bits2 = raw2 if raw2.dtype == jnp.uint32 else pltpu.bitcast(raw2, jnp.uint32)
        u1 = jnp.float32(1.0) - _bits_to_unit(bits1)   # (0, 1] -> safe for log
        u2 = _bits_to_unit(bits2)                      # [0, 1)
    else:
        # ---- software counter-hash fallback (non-TPU / interpret backends) ----
        # One hash per output PAIR; counter built from shifts + scalar base
        # (no per-element vector int multiplies). 16-bit uniforms are ample
        # for 0.1-stddev regularization noise.
        pid = pl.program_id(0)
        rows = lax.broadcasted_iota(jnp.int32, (tm, half), 0)
        cols = lax.broadcasted_iota(jnp.int32, (tm, half), 1)
        shift = int(math.log2(half))                       # half == 512
        idx = ((rows << shift) | cols).astype(jnp.uint32)
        base = (pid * (tm * half)).astype(jnp.uint32)      # scalar-unit multiply
        key = (seed_ref[0].astype(jnp.uint32) * jnp.uint32(0x9E3779B9)
               + jnp.uint32(0x7F4A7C15))
        bits = _hash32((base + idx) ^ key)
        hi = (bits >> jnp.uint32(16)).astype(jnp.float32)
        lo = (bits & jnp.uint32(0xFFFF)).astype(jnp.float32)
        u1 = (hi + jnp.float32(1.0)) * jnp.float32(1.0 / 65536.0)  # (0, 1]
        u2 = lo * jnp.float32(1.0 / 65536.0)                       # [0, 1)

    # ---- Box-Muller: one (log, sqrt, cos, sin) per PAIR of output elements ----
    r = jnp.sqrt(jnp.float32(-2.0) * jnp.log(u1))
    theta = jnp.float32(2.0 * math.pi) * u2
    s = jnp.float32(stddev)
    z_lo = r * jnp.cos(theta) * s
    z_hi = r * jnp.sin(theta) * s

    # Accumulate in f32, cast once; half = 512 keeps slices lane-aligned.
    o_ref[:, :half] = (x_ref[:, :half].astype(jnp.float32) + z_lo).astype(o_ref.dtype)
    o_ref[:, half:] = (x_ref[:, half:].astype(jnp.float32) + z_hi).astype(o_ref.dtype)


def gaussian_noise(x, seed, stddev=STDDEV, training=True, donate=False):
    """Pallas equivalent of GaussianNoise.forward.

    x: any-shape float array (NCHW in the original module). `seed` is an int32
    scalar standing in for torch.randn_like's global RNG state. Set donate=True
    only if the caller no longer needs x (aliases x into the output buffer).
    """
    if not training:
        return x  # eval mode: identity, no kernel needed.

    assert x.size < 2 ** 31, "noise stream counter would wrap"

    orig_shape = x.shape
    total = x.size
    flat = x.reshape(-1)

    main = (total // _LANES) * _LANES   # 1024-aligned prefix handled by the kernel
    tail = total - main

    use_hw_prng = jax.default_backend() == "tpu"
    parts = []

    if main > 0:
        m = main // _LANES
        if m > _MAX_TILE_ROWS:
            tm = _MAX_TILE_ROWS                    # grid >= 2 steps automatically
        elif m >= 32 and m % 32 == 0:
            tm = m // 2                            # >=2 steps so v7x megacore splits work
        else:
            tm = m                                 # full-dim block (always legal)
        grid = (pl.cdiv(m, tm),)

        x2 = flat[:main].reshape(m, _LANES)        # pure reshape when main == total
        seed_arr = jnp.asarray([seed], dtype=jnp.int32)

        out2 = pl.pallas_call(
            partial(gaussian_noise_kernel,
                    stddev=float(stddev), use_hw_prng=use_hw_prng),
            out_shape=jax.ShapeDtypeStruct((m, _LANES), x.dtype),
            grid=grid,
            in_specs=[
                pl.BlockSpec(memory_space=pltpu.MemorySpace.SMEM),   # seed scalar
                pl.BlockSpec((tm, _LANES), lambda i: (i, 0)),        # x tile
            ],
            out_specs=pl.BlockSpec((tm, _LANES), lambda i: (i, 0)),
            compiler_params=pltpu.CompilerParams(
                dimension_semantics=("parallel",),
                vmem_limit_bytes=32 * 1024 * 1024),
            input_output_aliases=({1: 0} if donate else {}),
        )(seed_arr, x2)
        parts.append(out2.reshape(-1))

    if tail > 0:
        # <1024-element tail: plain jnp, negligible cost, keeps the kernel copy-free.
        tail_key = jax.random.fold_in(jax.random.PRNGKey(seed), total)
        tail_x = flat[main:]
        tail_noise = jax.random.normal(tail_key, tail_x.shape, jnp.float32) * stddev
        parts.append((tail_x.astype(jnp.float32) + tail_noise).astype(x.dtype))

    out = parts[0] if len(parts) == 1 else jnp.concatenate(parts)
    return out.reshape(orig_shape)


if __name__ == "__main__":
    key = jax.random.PRNGKey(0)
    x = jax.random.normal(key, (2, 4, 16, 16), dtype=jnp.float32)  # NCHW

    # Training mode: x + noise * stddev
    y_train = jax.block_until_ready(
        gaussian_noise(x, seed=1234, stddev=STDDEV, training=True))

    # Eval mode: identity
    y_eval = jax.block_until_ready(
        gaussian_noise(x, seed=1234, stddev=STDDEV, training=False))

    assert y_train.shape == x.shape and y_train.dtype == x.dtype
    assert bool(jnp.all(y_eval == x))

    noise = y_train - x
    n_std = float(jnp.std(noise))
    n_mean = float(jnp.mean(noise))
    assert float(jnp.abs(noise).max()) > 0.0                 # noise was added
    assert float(jnp.abs(noise).max()) < 8.0 * STDDEV        # gaussian-scale tails
    assert 0.5 * STDDEV < n_std < 1.5 * STDDEV               # stddev roughly matches
    assert abs(n_mean) < 0.5 * STDDEV                        # roughly zero-mean

    print("KERNEL_OK")
</pallas_src>

<mosaic_0001>
module attributes {stable_mosaic.version = 11 : i64} {
  func.func @gaussian_noise_kernel(%arg0: i32, %arg1: memref<1xi32, #tpu.memory_space<smem>>, %arg2: memref<2x1024xf32, #tpu.memory_space<vmem>>, %arg3: memref<2x1024xf32, #tpu.memory_space<vmem>>) attributes {dimension_semantics = [#tpu.dimension_semantics<parallel>], iteration_bounds = array<i64: 1>, scalar_prefetch = 0 : i64, scratch_operands = 0 : i64, tpu.core_type = #tpu.core_type<tc>, window_params = [{transform_indices = @transform_0, window_bounds = array<i64: 1>}, {transform_indices = @transform_1, window_bounds = array<i64: 2, 1024>}, {transform_indices = @transform_2, window_bounds = array<i64: 2, 1024>}]} {
    %0 = tpu.iota {dimensions = array<i32: 0>} : vector<2x512xi32>
    %1 = tpu.iota {dimensions = array<i32: 1>} : vector<2x512xi32>
    %c9_i32 = arith.constant 9 : i32
    %2 = vector.broadcast %c9_i32 : i32 to vector<2x512xi32>
    %3 = arith.shli %0, %2 : vector<2x512xi32>
    %4 = arith.ori %3, %1 : vector<2x512xi32>
    %c1024_i32 = arith.constant 1024 : i32
    %5 = arith.muli %arg0, %c1024_i32 : i32
    %c0 = arith.constant 0 : index
    %6 = memref.load %arg1[%c0] : memref<1xi32, #tpu.memory_space<smem>>
    %c-1640531527_i32 = arith.constant -1640531527 : i32
    %7 = arith.muli %6, %c-1640531527_i32 : i32
    %c2135587861_i32 = arith.constant 2135587861 : i32
    %8 = arith.addi %7, %c2135587861_i32 : i32
    %9 = vector.broadcast %5 : i32 to vector<2x512xi32>
    %10 = arith.addi %9, %4 : vector<2x512xi32>
    %11 = vector.broadcast %8 : i32 to vector<2x512xi32>
    %12 = arith.xori %10, %11 : vector<2x512xi32>
    %c16_i32 = arith.constant 16 : i32
    %13 = vector.broadcast %c16_i32 : i32 to vector<2x512xi32>
    %14 = arith.shrui %12, %13 : vector<2x512xi32>
    %15 = arith.xori %12, %14 : vector<2x512xi32>
    %c2146121005_i32 = arith.constant 2146121005 : i32
    %16 = vector.broadcast %c2146121005_i32 : i32 to vector<2x512xi32>
    %17 = arith.muli %15, %16 : vector<2x512xi32>
    %c15_i32 = arith.constant 15 : i32
    %18 = vector.broadcast %c15_i32 : i32 to vector<2x512xi32>
    %19 = arith.shrui %17, %18 : vector<2x512xi32>
    %20 = arith.xori %17, %19 : vector<2x512xi32>
    %c-2073254261_i32 = arith.constant -2073254261 : i32
    %21 = vector.broadcast %c-2073254261_i32 : i32 to vector<2x512xi32>
    %22 = arith.muli %20, %21 : vector<2x512xi32>
    %c16_i32_0 = arith.constant 16 : i32
    %23 = vector.broadcast %c16_i32_0 : i32 to vector<2x512xi32>
    %24 = arith.shrui %22, %23 : vector<2x512xi32>
    %25 = arith.xori %22, %24 : vector<2x512xi32>
    %c16_i32_1 = arith.constant 16 : i32
    %26 = vector.broadcast %c16_i32_1 : i32 to vector<2x512xi32>
    %27 = arith.shrui %25, %26 : vector<2x512xi32>
    %28 = arith.uitofp %27 : vector<2x512xi32> to vector<2x512xf32>
    %c65535_i32 = arith.constant 65535 : i32
    %29 = vector.broadcast %c65535_i32 : i32 to vector<2x512xi32>
    %30 = arith.andi %25, %29 : vector<2x512xi32>
    %31 = arith.uitofp %30 : vector<2x512xi32> to vector<2x512xf32>
    %cst = arith.constant 1.000000e+00 : f32
    %32 = vector.broadcast %cst : f32 to vector<2x512xf32>
    %33 = arith.addf %28, %32 : vector<2x512xf32>
    %cst_2 = arith.constant 1.52587891E-5 : f32
    %34 = vector.broadcast %cst_2 : f32 to vector<2x512xf32>
    %35 = arith.mulf %33, %34 : vector<2x512xf32>
    %cst_3 = arith.constant 1.52587891E-5 : f32
    %36 = vector.broadcast %cst_3 : f32 to vector<2x512xf32>
    %37 = arith.mulf %31, %36 : vector<2x512xf32>
    %38 = math.log %35 : vector<2x512xf32>
    %cst_4 = arith.constant -2.000000e+00 : f32
    %39 = vector.broadcast %cst_4 : f32 to vector<2x512xf32>
    %40 = arith.mulf %39, %38 : vector<2x512xf32>
    %41 = math.sqrt %40 : vector<2x512xf32>
    %cst_5 = arith.constant 6.28318548 : f32
    %42 = vector.broadcast %cst_5 : f32 to vector<2x512xf32>
    %43 = arith.mulf %42, %37 : vector<2x512xf32>
    %44 = math.cos %43 : vector<2x512xf32>
    %45 = arith.mulf %41, %44 : vector<2x512xf32>
    %cst_6 = arith.constant 1.000000e-01 : f32
    %46 = vector.broadcast %cst_6 : f32 to vector<2x512xf32>
    %47 = arith.mulf %45, %46 : vector<2x512xf32>
    %48 = math.sin %43 : vector<2x512xf32>
    %49 = arith.mulf %41, %48 : vector<2x512xf32>
    %cst_7 = arith.constant 1.000000e-01 : f32
    %50 = vector.broadcast %cst_7 : f32 to vector<2x512xf32>
    %51 = arith.mulf %49, %50 : vector<2x512xf32>
    %c0_8 = arith.constant 0 : index
    %c0_9 = arith.constant 0 : index
    %52 = vector.load %arg2[%c0_8, %c0_9] : memref<2x1024xf32, #tpu.memory_space<vmem>>, vector<2x512xf32>
    %53 = arith.addf %52, %47 : vector<2x512xf32>
    %c0_10 = arith.constant 0 : index
    %c0_11 = arith.constant 0 : index
    %54 = vector.load %arg3[%c0_10, %c0_11] : memref<2x1024xf32, #tpu.memory_space<vmem>>, vector<2x512xf32>
    tpu.vector_store %arg3[%c0_10, %c0_11], %53 {strides = array<i32>} : memref<2x1024xf32, #tpu.memory_space<vmem>>, vector<2x512xf32>,
    %c0_12 = arith.constant 0 : index
    %c512 = arith.constant 512 : index
    %55 = vector.load %arg2[%c0_12, %c512] : memref<2x1024xf32, #tpu.memory_space<vmem>>, vector<2x512xf32>
    %56 = arith.addf %55, %51 : vector<2x512xf32>
    %c0_13 = arith.constant 0 : index
    %c512_14 = arith.constant 512 : index
    %57 = vector.load %arg3[%c0_13, %c512_14] : memref<2x1024xf32, #tpu.memory_space<vmem>>, vector<2x512xf32>
    tpu.vector_store %arg3[%c0_13, %c512_14], %56 {strides = array<i32>} : memref<2x1024xf32, #tpu.memory_space<vmem>>, vector<2x512xf32>,
    return
  }
  func.func @transform_0(%arg0: i32) -> i32 {
    %c0_i32 = arith.constant 0 : i32
    %c0_i32_0 = arith.constant 0 : i32
    return %c0_i32 : i32
  }
  func.func @transform_1(%arg0: i32) -> (i32, i32) {
    %c0_i32 = arith.constant 0 : i32
    %c0_i32_0 = arith.constant 0 : i32
    return %arg0, %c0_i32 : i32, i32
  }
  func.func @transform_2(%arg0: i32) -> (i32, i32) {
    %c0_i32 = arith.constant 0 : i32
    %c0_i32_0 = arith.constant 0 : i32
    return %arg0, %c0_i32 : i32, i32
  }
}

</mosaic_0001>

<bundles_post_ra>
// kernel: tpu_custom_call.1
= control target key start
LH: loop header
LB: loop body
LE: loop exit
PB: predicated region body
PF: predicated region fallthrough
CT: control target
= control target key end

     0   :  { %8 = vsyncpa [#allocation4], 0  ;;  %s1670_s0 = inlined_call_operand.<no memory space> [shape: s32[1], index: 0, kind: input, shape index: {}]   ;;  %s1671_s1 = inlined_call_operand.hbm [shape: f32[2,1024], index: 1, kind: input, shape index: {}]   ;;  %s1672_s2 = inlined_call_operand.hbm [shape: f32[2,1024], index: 2, kind: output, shape index: {}]  }
   0x1   :  { %9 = vsyncpa [#allocation5], 0  ;;  %s1241_s9 = smov [#allocation3]  }
   0x2   :  { %s18_s10 = sshll.u32 %s1241_s9, 4  ;;  %s19_s10 = int_to_ptr.vmem [resolvable:$true] %s18_s10 }
   0x3   :  { %s1205_s11 = scalar_lea.vmem %s19_s10, 256  ;;  %p1210_p1 = scmp.lt.s32.totalorder %s19_s10, %s19_s10 }
   0x4   :  { %p1206_p0 = scmp.ne.s32.totalorder %s19_s10, %s1205_s11  ;;  %p1211_p2 = scmp.lt.s32.totalorder %s1205_s11, %s1205_s11 }
   0x6   :  { %p1212_p3 = por %p1211_p2, %p1210_p1 }
   0x8   :  { %p1213_p4 = pnand %p1212_p3, %p1206_p0 }
   0xa   :  { %1216 = shalt.err (!%p1213_p4)
}
   0xb   :  { %21 = dma.hbm_to_vmem [thread:$0]  %s1671_s1, 256, %s19_s10, [#allocation4]  }
   0xc   :  { %1237 = dma.done.wait [#allocation4], 256  }
   0xd   :  { %1238 = vsyncadd [#allocation4], 4294967040  ;;  %v25_v0 = vlaneseq  ;;  %s39_s16 = smul.u32 2654435769, %s1670_s0  ;;  %s1249_s0 = smov [#allocation6]  }
   0xe   :  { %s1095_s1 = sshll.u32 %s1249_s0, 4  ;;  %s1096_s1 = int_to_ptr.vmem [resolvable:$true] %s1095_s1 }
   0xf   :  { %v1271_v1 = vshrl.u32 %v25_v0, 7  ;;  %v28_v2 = vand.u32 127, %v25_v0  ;;  %s40_s17 = sadd.s32 2135587861, %s39_s16  ;;  %s1217_s18 = scalar_lea.vmem %s1096_s1, 256 }
  0x10   :  { %v46_v6 = vstv %s40_s17  ;;  %p1218_p5 = scmp.ne.s32.totalorder %s1096_s1, %s1217_s18  ;;  %p1222_p6 = scmp.lt.s32.totalorder %s1096_s1, %s1096_s1 }
  0x11   :  { %v29_v3 = vadd.s32 128, %v28_v2  ;;  %v30_v4 = vadd.s32 256, %v28_v2  ;;  %v32_v5 = vshll.u32 %v1271_v1, 9  ;;  %v31_v10 = vadd.s32 384, %v28_v2  ;;  %p1223_p7 = scmp.lt.s32.totalorder %s1217_s18, %s1217_s18 }
  0x13   :  { %v33_v7 = vor.u32 %v32_v5, %v28_v2  ;;  %v34_v8 = vor.u32 %v32_v5, %v29_v3  ;;  %v35_v9 = vor.u32 %v32_v5, %v30_v4  ;;  %v36_v17 = vor.u32 %v32_v5, %v31_v10  ;;  %p1224_p8 = por %p1223_p7, %p1222_p6 }
  0x15   :  { %v47_v11 = vxor.u32 %v46_v6, %v33_v7  ;;  %v48_v12 = vxor.u32 %v46_v6, %v34_v8  ;;  %v49_v13 = vxor.u32 %v46_v6, %v35_v9  ;;  %v50_v24 = vxor.u32 %v46_v6, %v36_v17  ;;  %p1225_p9 = pnand %p1224_p8, %p1218_p5 }
  0x17   :  { %v51_v14 = vshrl.u32 %v47_v11, 16  ;;  %v52_v15 = vshrl.u32 %v48_v12, 16  ;;  %v53_v16 = vshrl.u32 %v49_v13, 16  ;;  %v54_v31 = vshrl.u32 %v50_v24, 16 }
  0x19   :  { %v55_v18 = vxor.u32 %v51_v14, %v47_v11  ;;  %v56_v19 = vxor.u32 %v52_v15, %v48_v12  ;;  %v57_v20 = vxor.u32 %v53_v16, %v49_v13  ;;  %v58_v37 = vxor.u32 %v54_v31, %v50_v24 }
  0x1a   :  { %v1242_v31 = vmov 683565275  }
  0x1b   :  { %v59_v21 = vmul.u32 2146121005, %v55_v18  ;;  %v60_v22 = vmul.u32 2146121005, %v56_v19 }
  0x1c   :  { %v61_v23 = vmul.u32 2146121005, %v57_v20  ;;  %v62_v43 = vmul.u32 2146121005, %v58_v37 }
  0x1d   :  { %v63_v25 = vshrl.u32 %v59_v21, 15  ;;  %v64_v26 = vshrl.u32 %v60_v22, 15 }
  0x1e   :  { %v65_v27 = vshrl.u32 %v61_v23, 15  ;;  %v66_v47 = vshrl.u32 %v62_v43, 15 }
  0x1f   :  { %v67_v28 = vxor.u32 %v63_v25, %v59_v21  ;;  %v68_v29 = vxor.u32 %v64_v26, %v60_v22 }
  0x20   :  { %v69_v30 = vxor.u32 %v65_v27, %v61_v23  ;;  %v70_v55 = vxor.u32 %v66_v47, %v62_v43 }
  0x21   :  { %v71_v32 = vmul.u32 2221713035, %v67_v28  ;;  %v72_v33 = vmul.u32 2221713035, %v68_v29 }
  0x22   :  { %v73_v34 = vmul.u32 2221713035, %v69_v30  ;;  %v74_v61 = vmul.u32 2221713035, %v70_v55 }
  0x23   :  { %v75_v35 = vshrl.u32 %v71_v32, 16  ;;  %v76_v36 = vshrl.u32 %v72_v33, 16 }
  0x24   :  { %v77_v40 = vshrl.u32 %v73_v34, 16  ;;  %v78_v3 = vshrl.u32 %v74_v61, 16 }
  0x25   :  { %v79_v38 = vxor.u32 %v75_v35, %v71_v32  ;;  %v80_v39 = vxor.u32 %v76_v36, %v72_v33  ;;  %v1243_v33 = vmov 2475754826  }
  0x26   :  { %v1274_v44 = vxor.u32 %v77_v40, %v73_v34  ;;  %v1283_v10 = vxor.u32 %v78_v3, %v74_v61 }
  0x27   :  { %v111_v41 = vand.u32 65535, %v79_v38  ;;  %v112_v42 = vand.u32 65535, %v80_v39  ;;  %v83_v19 = vshrl.u32 %v79_v38, 16  ;;  %v84_v20 = vshrl.u32 %v80_v39, 16 }
  0x28   :  { %v113_v50 = vand.u32 65535, %v1274_v44  ;;  %v114_v14 = vand.u32 65535, %v1283_v10  ;;  %v85_v21 = vshrl.u32 %v1274_v44, 16  ;;  %v86_v26 = vshrl.u32 %v1283_v10, 16 }
  0x29   :  { %v115_v45 = vshrl.u32 %v111_v41, 16  ;;  %v121_v46 = vshrl.u32 %v112_v42, 16  ;;  %v119_v49 = vcvt.s32.f32 %v111_v41  ;;  %v125_v52 = vcvt.s32.f32 %v112_v42 }
  0x2a   :  { %v127_v58 = vshrl.u32 %v113_v50, 16  ;;  %v131_v5 = vcvt.s32.f32 %v113_v50  ;;  %v133_v24 = vshrl.u32 %v114_v14, 16  ;;  %v1296_v29 = vshrl.u32 %v83_v19, 16 }
  0x2b   :  { %v117_v48 = vcvt.s32.f32 %v115_v45  ;;  %v123_v51 = vcvt.s32.f32 %v121_v46  ;;  %v1298_v30 = vcvt.s32.f32 %v83_v19  ;;  %v1302_v35 = vshrl.u32 %v84_v20, 16 }
  0x2c   :  { %v129_v63 = vcvt.s32.f32 %v127_v58  ;;  %v1304_v36 = vcvt.s32.f32 %v84_v20  ;;  %v1308_v37 = vshrl.u32 %v85_v21, 16  ;;  %v135_v38 = vcvt.s32.f32 %v133_v24 }
  0x2d   :  { %v118_v53 = vmul.f32 65536.0, %v117_v48  ;;  %v124_v54 = vmul.f32 65536.0, %v123_v51  ;;  %v1244_v42 = vmov 2131351028   ;;  %v1245_v45 = vmov 2102212464  }
  0x2e   :  { %v130_v4 = vmul.f32 65536.0, %v129_v63 }
  0x2f   :  { %v120_v56 = vadd.f32 %v119_v49, %v118_v53  ;;  %v126_v57 = vadd.f32 %v125_v52, %v124_v54  ;;  %v1246_v54 = vmov 920167782  }
  0x30   :  { %v132_v11 = vadd.f32 %v131_v5, %v130_v4 }
  0x31   :  { %v147_v59 = vmul.f32 1.5258789e-05, %v120_v56  ;;  %v148_v60 = vmul.f32 1.5258789e-05, %v126_v57  ;;  %v1247_v57 = vmov 1326507024  }
  0x32   :  { %v149_v17 = vmul.f32 1.5258789e-05, %v132_v11 }
  0x33   :  { %v1277_v62 = vmul.f32 6.2831855, %v147_v59  ;;  %v1279_v0 = vmul.f32 6.2831855, %v148_v60 }
  0x34   :  { %v1293_v27 = vmul.f32 6.2831855, %v149_v17  ;;  %v1329_v17 = vshrl.u32 %v86_v26, 16 }
  0x35   :  { %v198_v2 = vand.u32 2139095040, %v1277_v62  ;;  %v301_v7 = vand.u32 2139095040, %v1279_v0  ;;  %v195_v15 = vand.u32 2147483647, %v1277_v62  ;;  %v298_v28 = vand.u32 2147483647, %v1279_v0 }
  0x36   :  { %v404_v48 = vand.u32 2139095040, %v1293_v27 }
  0x37   :  { %v199_v6 = vshrl.u32 %v198_v2, 23  ;;  %v302_v9 = vshrl.u32 %v301_v7, 23  ;;  %v202_v25 = vand.u32 8388607, %v195_v15  ;;  %v1315_v47 = vand.u32 8388607, %v298_v28 }
  0x38   :  { %v405_v20 = vshrl.u32 %v404_v48, 23 }
  0x39   :  { %v1108_v8 = vadd.s32 4294967169, %v199_v6  ;;  %v1112_v13 = vadd.s32 4294967169, %v302_v9  ;;  %v203_v39 = vor.u32 8388608, %v202_v25 }
  0x3b   :  { %v205_v12 = vadd.s32 1, %v1108_v8  ;;  %v308_v23 = vadd.s32 1, %v1112_v13  ;;  %v243_v60 = vshll.u32 %v203_v39, 8 }
  0x3d   :  { %vm206_vm0 = vcmp.gt.s32.totalorder %v205_v12, 0  ;;  %vm309_vm1 = vcmp.gt.s32.totalorder %v308_v23, 0 }
  0x3e   :  { %v207_v16 = vsel %vm206_vm0, %v205_v12, 0  ;;  %v310_v52 = vsel %vm309_vm1, %v308_v23, 0 }
  0x3f   :  { %v209_v18 = vand.u32 31, %v207_v16  ;;  %v208_v40 = vshrl.u32 %v207_v16, 5  ;;  %v312_v5 = vand.u32 31, %v310_v52 }
  0x41   :  { %v210_v22 = vsub.s32 32, %v209_v18  ;;  %v212_v32 = vshll.u32 %v1242_v31, %v209_v18  ;;  %v215_v41 = vshll.u32 %v1243_v33, %v209_v18  ;;  %v218_v43 = vshll.u32 %v1244_v42, %v209_v18 }
  0x42   :  { %v221_v46 = vshll.u32 %v1245_v45, %v209_v18  ;;  %v224_v56 = vshll.u32 %v1246_v54, %v209_v18  ;;  %vm227_vm2 = vcmp.lt.s32.totalorder %v208_v40, 1  ;;  %vm229_vm3 = vcmp.lt.s32.totalorder %v208_v40, 3 }
  0x43   :  { %v213_v34 = vshrl.u32 %v1243_v33, %v210_v22  ;;  %v211_v49 = vshrl.u32 %v1242_v31, %v210_v22  ;;  %v216_v51 = vshrl.u32 %v1244_v42, %v210_v22  ;;  %v219_v53 = vshrl.u32 %v1245_v45, %v210_v22 }
  0x44   :  { %v222_v55 = vshrl.u32 %v1246_v54, %v210_v22  ;;  %v225_v58 = vshrl.u32 %v1247_v57, %v210_v22  ;;  %vm230_vm4 = vcmp.lt.s32.totalorder %v208_v40, 4  ;;  %vm228_vm5 = vcmp.lt.s32.totalorder %v208_v40, 2 }
  0x45   :  { %v214_v50 = vor.u32 %v213_v34, %v212_v32  ;;  %v217_v59 = vor.u32 %v216_v51, %v215_v41  ;;  %v220_v61 = vor.u32 %v219_v53, %v218_v43  ;;  %v313_v16 = vsub.s32 32, %v312_v5 }
  0x46   :  { %v223_v63 = vor.u32 %v222_v55, %v221_v46  ;;  %v226_v2 = vor.u32 %v225_v58, %v224_v56  ;;  %v136_v32 = vmul.f32 65536.0, %v135_v38  ;;  %v137_v34 = vcvt.s32.f32 %v114_v14 }
  0x47   :  { %v231_v3 = vsel %vm227_vm2, %v211_v49, %v214_v50  ;;  %v235_v4 = vsel %vm227_vm2, %v214_v50, %v217_v59  ;;  %v232_v6 = vsel %vm230_vm4, %v220_v61, 2102212464  ;;  %v239_v8 = vsel %vm227_vm2, %v217_v59, %v220_v61 }
  0x48   :  { %v236_v7 = vsel %vm230_vm4, %v223_v63, 920167782  ;;  %v240_v9 = vsel %vm230_vm4, %v226_v2, 1326507024  ;;  %v233_v11 = vsel %vm229_vm3, %v217_v59, %v232_v6  ;;  %v306_v41 = vor.u32 8388608, %v1315_v47 }
  0x49   :  { %v237_v12 = vsel %vm229_vm3, %v220_v61, %v236_v7  ;;  %v241_v13 = vsel %vm229_vm3, %v223_v63, %v240_v9  ;;  %v234_v39 = vsel %vm228_vm5, %v231_v3, %v233_v11  ;;  %v315_v43 = vshll.u32 %v1242_v31, %v312_v5 }
  0x4a   :  { %v238_v18 = vsel %vm228_vm5, %v235_v4, %v237_v12  ;;  %v242_v19 = vsel %vm228_vm5, %v239_v8, %v241_v13  ;;  %v316_v46 = vshrl.u32 %v1243_v33, %v313_v16  ;;  %v318_v48 = vshll.u32 %v1243_v33, %v312_v5 }
  0x4b   :  { %v1333_v22 = vmul.u32.u64.low %v243_v60, %v242_v19  ;;  %v1334_v23 = vmul.u32.u64.high %v243_v60, %v242_v19, %v1333_v22  ;;  %v1336_v24 = vmul.u32.u64.low %v243_v60, %v238_v18  ;;  %v1337_v25 = vmul.u32.u64.high %v243_v60, %v238_v18, %v1336_v24 }
  0x4c   :  { %v319_v49 = vshrl.u32 %v1244_v42, %v313_v16  ;;  %v321_v50 = vshll.u32 %v1244_v42, %v312_v5  ;;  %v322_v51 = vshrl.u32 %v1245_v45, %v313_v16  ;;  %v324_v38 = vshll.u32 %v1245_v45, %v312_v5 }
  0x4d   :  { %v325_v14 = vshrl.u32 %v1246_v54, %v313_v16  ;;  %v89_v40 = vcvt.s32.f32 %v1296_v29  ;;  %v250_v53 = vmul.u32 %v243_v60, %v234_v39  ;;  %vm252_vm6 = vc.u32 %v1334_v23, %v1336_v24 }
  0x4e   :  { %v1116_v47 = vadd.s32 4294967169, %v405_v20  ;;  %v95_v55 = vcvt.s32.f32 %v1302_v35  ;;  %v101_v56 = vcvt.s32.f32 %v1308_v37  ;;  %v253_v58 = vadd.s32 1, %v1337_v25 }
  0x4f   :  { %v311_v59 = vshrl.u32 %v310_v52, 5  ;;  %v138_v61 = vadd.f32 %v137_v34, %v136_v32  ;;  %v314_v63 = vshrl.u32 %v1242_v31, %v313_v16  ;;  %v317_v2 = vor.u32 %v316_v46, %v315_v43 }
  0x50   :  { %v346_v3 = vshll.u32 %v306_v41, 8  ;;  %v254_v4 = vsel %vm252_vm6, %v253_v58, %v1337_v25  ;;  %v320_v29 = vor.u32 %v319_v49, %v318_v48  ;;  %v323_v60 = vor.u32 %v322_v51, %v321_v50 }
  0x51   :  { %v326_v6 = vor.u32 %v325_v14, %v324_v38  ;;  %v255_v7 = vadd.s32 %v254_v4, %v250_v53  ;;  %v327_v8 = vshll.u32 %v1246_v54, %v312_v5  ;;  %v328_v35 = vshrl.u32 %v1247_v57, %v313_v16 }
  0x52   :  { %v411_v9 = vadd.s32 1, %v1116_v47  ;;  %vm330_vm7 = vcmp.lt.s32.totalorder %v311_v59, 1  ;;  %vm331_vm8 = vcmp.lt.s32.totalorder %v311_v59, 2  ;;  %vm332_vm9 = vcmp.lt.s32.totalorder %v311_v59, 3 }
  0x53   :  { %vm333_vm10 = vcmp.lt.s32.totalorder %v311_v59, 4  ;;  %v256_v37 = vadd.s32 536870912, %v255_v7  ;;  %v329_v52 = vor.u32 %v328_v35, %v327_v8  ;;  %v334_v11 = vsel %vm330_vm7, %v314_v63, %v317_v2 }
  0x54   :  { %v335_v12 = vsel %vm333_vm10, %v323_v60, 2102212464  ;;  %v338_v18 = vsel %vm330_vm7, %v317_v2, %v320_v29  ;;  %v339_v19 = vsel %vm333_vm10, %v326_v6, 920167782  ;;  %v342_v20 = vsel %vm330_vm7, %v320_v29, %v323_v60 }
  0x55   :  { %v336_v13 = vsel %vm332_vm9, %v320_v29, %v335_v12  ;;  %v150_v22 = vmul.f32 1.5258789e-05, %v138_v61  ;;  %v1363_v25 = vshrl.u32 %v256_v37, 30  ;;  %v340_v5 = vsel %vm332_vm9, %v323_v60, %v339_v19 }
  0x56   :  { %v343_v16 = vsel %vm333_vm10, %v329_v52, 1326507024  ;;  %v107_v32 = vcvt.s32.f32 %v1329_v17  ;;  %v341_v34 = vsel %vm331_vm8, %v338_v18, %v340_v5  ;;  %vm412_vm11 = vcmp.gt.s32.totalorder %v411_v9, 0 }
  0x57   :  { %v344_v39 = vsel %vm332_vm9, %v326_v6, %v343_v16  ;;  %v258_v41 = vshll.u32 %v1363_v25, 30  ;;  %v337_v43 = vsel %vm331_vm8, %v334_v11, %v336_v13  ;;  %v413_v48 = vsel %vm412_vm11, %v411_v9, 0 }
  0x58   :  { %v345_v46 = vsel %vm331_vm8, %v342_v20, %v344_v39  ;;  %v1375_v51 = vmul.u32.u64.low %v346_v3, %v341_v34  ;;  %v1376_v38 = vmul.u32.u64.high %v346_v3, %v341_v34, %v1375_v51  ;;  %v90_v17 = vmul.f32 65536.0, %v89_v40 }
  0x59   :  { %v1372_v49 = vmul.u32.u64.low %v346_v3, %v345_v46  ;;  %v1373_v50 = vmul.u32.u64.high %v346_v3, %v345_v46, %v1372_v49  ;;  %v96_v14 = vmul.f32 65536.0, %v95_v55  ;;  %v1379_v53 = vmul.f32 6.2831855, %v150_v22 }
  0x5a   :  { %v415_v47 = vand.u32 31, %v413_v48  ;;  %v1381_v58 = vsub.s32 %v255_v7, %v258_v41  ;;  %v103_v61 = vcvt.s32.f32 %v85_v21  ;;  %v109_v59 = vcvt.s32.f32 %v86_v26 }
  0x5b   :  { %v353_v63 = vmul.u32 %v346_v3, %v337_v43  ;;  %v102_v4 = vmul.f32 65536.0, %v101_v56  ;;  %v108_v29 = vmul.f32 65536.0, %v107_v32  ;;  %vm355_vm12 = vc.u32 %v1373_v50, %v1375_v51 }
  0x5c   :  { %v416_v2 = vsub.s32 32, %v415_v47  ;;  %v356_v40 = vadd.s32 1, %v1376_v38  ;;  %v92_v55 = vadd.f32 %v1298_v30, %v90_v17  ;;  %v98_v60 = vadd.f32 %v1304_v36, %v96_v14 }
  0x5d   :  { %v401_v6 = vand.u32 2147483647, %v1293_v27  ;;  %v507_v44 = vand.u32 2139095040, %v1379_v53  ;;  %v261_v10 = vsub.s32 0, %v1381_v58  ;;  %v414_v26 = vshrl.u32 %v413_v48, 5 }
  0x5e   :  { %v357_v21 = vsel %vm355_vm12, %v356_v40, %v1376_v38  ;;  %v418_v56 = vshll.u32 %v1242_v31, %v415_v47  ;;  %v419_v7 = vshrl.u32 %v1243_v33, %v416_v2  ;;  %v421_v8 = vshll.u32 %v1243_v33, %v415_v47 }
  0x5f   :  { %v358_v3 = vadd.s32 %v357_v21, %v353_v63  ;;  %v422_v30 = vshrl.u32 %v1244_v42, %v416_v2  ;;  %v424_v36 = vshll.u32 %v1244_v42, %v415_v47  ;;  %v425_v35 = vshrl.u32 %v1245_v45, %v416_v2 }
  0x60   :  { %v427_v9 = vshll.u32 %v1245_v45, %v415_v47  ;;  %v428_v37 = vshrl.u32 %v1246_v54, %v416_v2  ;;  %v104_v52 = vadd.f32 %v103_v61, %v102_v4  ;;  %v408_v12 = vand.u32 8388607, %v401_v6 }
  0x61   :  { %v359_v11 = vadd.s32 536870912, %v358_v3  ;;  %v430_v13 = vshll.u32 %v1246_v54, %v415_v47  ;;  %v110_v18 = vadd.f32 %v109_v59, %v108_v29  ;;  %v1109_v19 = vmin.u32 %v261_v10, %v1381_v58 }
  0x62   :  { %v429_v20 = vor.u32 %v428_v37, %v427_v9  ;;  %v431_v22 = vshrl.u32 %v1247_v57, %v416_v2  ;;  %v139_v5 = vadd.f32 1.0, %v92_v55  ;;  %vm436_vm13 = vcmp.lt.s32.totalorder %v414_v26, 4 }
  0x63   :  { %v1409_v16 = vshrl.u32 %v359_v11, 30  ;;  %v508_v32 = vshrl.u32 %v507_v44, 23  ;;  %v420_v34 = vor.u32 %v419_v7, %v418_v56  ;;  %v423_v39 = vor.u32 %v422_v30, %v421_v8 }
  0x64   :  { %v426_v41 = vor.u32 %v425_v35, %v424_v36  ;;  %v432_v43 = vor.u32 %v431_v22, %v430_v13  ;;  %v409_v48 = vor.u32 8388608, %v408_v12  ;;  %vm433_vm14 = vcmp.lt.s32.totalorder %v414_v26, 1 }
  0x65   :  { %v361_v46 = vshll.u32 %v1409_v16, 30  ;;  %vm435_vm15 = vcmp.lt.s32.totalorder %v414_v26, 3  ;;  %v140_v49 = vadd.f32 1.0, %v98_v60  ;;  %v263_v38 = vclz %v1109_v19 }
  0x66   :  { %v417_v17 = vshrl.u32 %v1242_v31, %v416_v2  ;;  %v442_v14 = vsel %vm436_vm13, %v429_v20, 920167782  ;;  %vm434_vm0 = vcmp.lt.s32.totalorder %v414_v26, 2  ;;  %v438_v61 = vsel %vm436_vm13, %v426_v41, 2102212464 }
  0x67   :  { %v1414_v47 = vsub.s32 %v358_v3, %v361_v46  ;;  %v1120_v59 = vadd.s32 4294967169, %v508_v32  ;;  %v441_v63 = vsel %vm433_vm14, %v420_v34, %v423_v39  ;;  %v443_v4 = vsel %vm435_vm15, %v426_v41, %v442_v14 }
  0x68   :  { %v445_v29 = vsel %vm433_vm14, %v423_v39, %v426_v41  ;;  %v446_v40 = vsel %vm436_vm13, %v432_v43, 1326507024  ;;  %v449_v60 = vshll.u32 %v409_v48, 8  ;;  %v141_v2 = vadd.f32 1.0, %v104_v52 }
  0x69   :  { %v364_v55 = vsub.s32 0, %v1414_v47  ;;  %v1110_v44 = vadd.s32 4294967294, %v263_v38  ;;  %v437_v10 = vsel %vm433_vm14, %v417_v17, %v420_v34  ;;  %v447_v21 = vsel %vm435_vm15, %v429_v20, %v446_v40 }
  0x6a   :  { %v439_v3 = vsel %vm435_vm15, %v423_v39, %v438_v61  ;;  %v444_v7 = vsel %vm434_vm0, %v441_v63, %v443_v4  ;;  %v448_v8 = vsel %vm434_vm0, %v445_v29, %v447_v21  ;;  %v142_v30 = vadd.f32 1.0, %v110_v18 }
  0x6b   :  { %v1113_v56 = vmin.u32 %v364_v55, %v1414_v47  ;;  %v143_v36 = vmul.f32 1.5258789e-05, %v139_v5  ;;  %v144_v35 = vmul.f32 1.5258789e-05, %v140_v49  ;;  %v514_v9 = vadd.s32 1, %v1120_v59 }
  0x6c   :  { %v1428_v11 = vmul.u32.u64.low %v449_v60, %v448_v8  ;;  %v1429_v52 = vmul.u32.u64.high %v449_v60, %v448_v8, %v1428_v11  ;;  %v504_v12 = vand.u32 2147483647, %v1379_v53  ;;  %v440_v13 = vsel %vm434_vm0, %v437_v10, %v439_v3 }
  0x6d   :  { %v366_v37 = vclz %v1113_v56  ;;  %v1433_v19 = vmul.u32.u64.low %v449_v60, %v444_v7  ;;  %v1434_v20 = vmul.u32.u64.high %v449_v60, %v444_v7, %v1433_v19  ;;  %vm515_vm1 = vcmp.gt.s32.totalorder %v514_v9, 0 }
  0x6e   :  { %v145_v22 = vmul.f32 1.5258789e-05, %v141_v2  ;;  %vm1111_vm2 = vcmp.lt.s32.totalorder %v1110_v44, 0  ;;  %v516_v18 = vsel %vm515_vm1, %v514_v9, 0  ;;  %v146_v5 = vmul.f32 1.5258789e-05, %v142_v30 }
  0x6f   :  { %v1114_v32 = vadd.s32 4294967294, %v366_v37  ;;  %v518_v34 = vand.u32 31, %v516_v18  ;;  %1165 = vlog2.f32 %v143_v36  ;;  %v456_v39 = vmul.u32 %v449_v60, %v440_v13 }
  0x70   :  { %vm458_vm3 = vc.u32 %v1429_v52, %v1433_v19  ;;  %v511_v26 = vand.u32 8388607, %v504_v12  ;;  %1167 = vlog2.f32 %v144_v35  ;;  %v266_v41 = vsel %vm1111_vm2, 0, %v1110_v44 }
  0x71   :  { %v459_v43 = vadd.s32 1, %v1434_v20  ;;  %1169 = vlog2.f32 %v145_v22  ;;  %vm1115_vm4 = vcmp.lt.s32.totalorder %v1114_v32, 0  ;;  %v519_v46 = vsub.s32 32, %v518_v34 }
  0x72   :  { %1171 = vlog2.f32 %v146_v5  ;;  %v251_v49 = vadd.s32 %v1336_v24, %v1334_v23  ;;  %v271_v38 = vsub.s32 4294967266, %v266_v41  ;;  %v512_v14 = vor.u32 8388608, %v511_v26 }
  0x73   :  { %v460_v48 = vsel %vm458_vm3, %v459_v43, %v1434_v20  ;;  %v267_v61 = vsub.s32 32, %v266_v41  ;;  %v1445_v59 = vsel %vm1115_vm4, 0, %v1114_v32  ;;  %v517_v63 = vshrl.u32 %v516_v18, 5 }
  0x74   :  { %v461_v17 = vadd.s32 %v460_v48, %v456_v39  ;;  %v521_v4 = vshll.u32 %v1242_v31, %v518_v34  ;;  %v522_v40 = vshrl.u32 %v1243_v33, %v519_v46  ;;  %v524_v55 = vshll.u32 %v1243_v33, %v518_v34 }
  0x75   :  { %v525_v60 = vshrl.u32 %v1244_v42, %v519_v46  ;;  %v527_v2 = vshll.u32 %v1244_v42, %v518_v34  ;;  %v528_v23 = vshrl.u32 %v1245_v45, %v519_v46  ;;  %v530_v24 = vshll.u32 %v1245_v45, %v518_v34 }
  0x76   :  { %v462_v29 = vadd.s32 536870912, %v461_v17  ;;  %v531_v44 = vshrl.u32 %v1246_v54, %v519_v46  ;;  %v268_v10 = vshll.u32 %v1381_v58, %v266_v41  ;;  %v272_v21 = vadd.s32 127, %v271_v38 }
  0x77   :  { %v533_v3 = vshll.u32 %v1246_v54, %v518_v34  ;;  %v269_v7 = vshrl.u32 %v251_v49, %v267_v61  ;;  %v374_v33 = vsub.s32 4294967266, %v1445_v59  ;;  %v534_v30 = vshrl.u32 %v1247_v57, %v519_v46 }
  0x78   :  { %v1456_v56 = vshrl.u32 %v462_v29, 30  ;;  %v532_v8 = vor.u32 %v531_v44, %v530_v24  ;;  %v354_v42 = vadd.s32 %v1375_v51, %v1373_v50  ;;  %v523_v36 = vor.u32 %v522_v40, %v521_v4 }
  0x79   :  { %v526_v35 = vor.u32 %v525_v60, %v524_v55  ;;  %v529_v9 = vor.u32 %v528_v23, %v527_v2  ;;  %v535_v58 = vor.u32 %v534_v30, %v533_v3  ;;  %vm536_vm5 = vcmp.lt.s32.totalorder %v517_v63, 1 }
  0x7a   :  { %v464_v45 = vshll.u32 %v1456_v56, 30  ;;  %vm539_vm6 = vcmp.lt.s32.totalorder %v517_v63, 4  ;;  %v273_v37 = vshll.u32 %v272_v21, 23  ;;  %v370_v54 = vsub.s32 32, %v1445_v59 }
  0x7b   :  { %vm538_vm7 = vcmp.lt.s32.totalorder %v517_v63, 3  ;;  %v270_v20 = vor.u32 %v269_v7, %v268_v10  ;;  %v375_v22 = vadd.s32 127, %v374_v33  ;;  %v520_v57 = vshrl.u32 %v1242_v31, %v519_v46 }
  0x7c   :  { %v465_v11 = vsub.s32 %v461_v17, %v464_v45  ;;  %v1166_v13 = vpop.eup %1165  ;;  %v545_v50 = vsel %vm539_vm6, %v532_v8, 920167782  ;;  %vm537_vm8 = vcmp.lt.s32.totalorder %v517_v63, 2  ;;  %v541_v18 = vsel %vm539_vm6, %v529_v9, 2102212464 }
  0x7d   :  { %v1168_v51 = vpop.eup %1167  ;;  %v544_v5 = vsel %vm536_vm5, %v523_v36, %v526_v35  ;;  %v546_v39 = vsel %vm538_vm7, %v529_v9, %v545_v50  ;;  %v548_v26 = vsel %vm536_vm5, %v526_v35, %v529_v9  ;;  %v549_v41 = vsel %vm539_vm6, %v535_v58, 1326507024 }
  0x7e   :  { %v467_v32 = vsub.s32 0, %v465_v11  ;;  %v1170_v34 = vpop.eup %1169  ;;  %v552_v43 = vshll.u32 %v512_v14, 8  ;;  %v274_v49 = vor.u32 4788187, %v273_v37  ;;  %v371_v31 = vshll.u32 %v1414_v47, %v1445_v59 }
  0x7f   :  { %v1172_v48 = vpop.eup %1171  ;;  %v372_v46 = vshrl.u32 %v354_v42, %v370_v54  ;;  %v540_v17 = vsel %vm536_vm5, %v520_v57, %v523_v36  ;;  %v542_v61 = vsel %vm538_vm7, %v526_v35, %v541_v18  ;;  %v547_v4 = vsel %vm537_vm8, %v544_v5, %v546_v39 }
  0x80   :  { %v1117_v38 = vmin.u32 %v467_v32, %v465_v11  ;;  %v550_v29 = vsel %vm538_vm7, %v532_v8, %v549_v41  ;;  %v376_v40 = vshll.u32 %v375_v22, 23  ;;  %v543_v47 = vsel %vm537_vm8, %v540_v17, %v542_v61 }
  0x81   :  { %v551_v60 = vsel %vm537_vm8, %v548_v26, %v550_v29  ;;  %v1483_v59 = vmul.u32.u64.low %v552_v43, %v547_v4  ;;  %v1484_v24 = vmul.u32.u64.high %v552_v43, %v547_v4, %v1483_v59  ;;  %v275_v44 = vand.u32 2147483647, %v274_v49 }
  0x82   :  { %v469_v55 = vclz %v1117_v38  ;;  %v1479_v14 = vmul.u32.u64.low %v552_v43, %v551_v60  ;;  %v1480_v2 = vmul.u32.u64.high %v552_v43, %v551_v60, %v1479_v14  ;;  %v277_v10 = vcvt.s32.f32 %v270_v20 }
  0x83   :  { %v373_v21 = vor.u32 %v372_v46, %v371_v31  ;;  %v152_v3 = vmul.f32 0.6931472, %v1166_v13  ;;  %v377_v7 = vor.u32 4788187, %v376_v40  ;;  %v457_v33 = vadd.s32 %v1433_v19, %v1429_v52 }
  0x84   :  { %v1118_v23 = vadd.s32 4294967294, %v469_v55  ;;  %v154_v8 = vmul.f32 0.6931472, %v1168_v51  ;;  %v559_v42 = vmul.u32 %v552_v43, %v543_v47  ;;  %vm561_vm10 = vc.u32 %v1480_v2, %v1483_v59 }
  0x85   :  { %v562_v35 = vadd.s32 1, %v1484_v24  ;;  %v278_v9 = vmul.f32 %v277_v10, %v275_v44  ;;  %v380_v58 = vcvt.s32.f32 %v373_v21  ;;  %v378_v37 = vand.u32 2147483647, %v377_v7 }
  0x86   :  { %vm1119_vm9 = vcmp.lt.s32.totalorder %v1118_v23, 0  ;;  %v1493_v52 = vmul.f32 -2.0, %v152_v3  ;;  %v1495_v22 = vmul.f32 -2.0, %v154_v8  ;;  %v156_v51 = vmul.f32 0.6931472, %v1170_v34 }
  0x87   :  { %v472_v30 = vsel %vm1119_vm9, 0, %v1118_v23  ;;  %v563_v20 = vsel %vm561_vm10, %v562_v35, %v1484_v24  ;;  %v279_v32 = vxor.u32 2147483648, %v278_v9  ;;  %v158_v18 = vmul.f32 0.6931472, %v1172_v48 }
  0x88   :  { %v473_v63 = vsub.s32 32, %v472_v30  ;;  %v474_v45 = vshll.u32 %v465_v11, %v472_v30  ;;  %v477_v36 = vsub.s32 4294967266, %v472_v30  ;;  %v564_v19 = vadd.s32 %v563_v20, %v559_v42 }
  0x89   :  { %vm197_vm11 = vcmp.lt.s32.totalorder %v1277_v62, 0  ;;  %v381_v5 = vmul.f32 %v380_v58, %v378_v37  ;;  %1173 = vrsqrt.f32 %v1493_v52  ;;  %v1502_v49 = vmul.f32 -2.0, %v156_v51 }
  0x8a   :  { %v475_v54 = vshrl.u32 %v457_v33, %v473_v63  ;;  %v478_v13 = vadd.s32 127, %v477_v36  ;;  %v565_v11 = vadd.s32 536870912, %v564_v19  ;;  %1175 = vrsqrt.f32 %v1495_v22 }
  0x8b   :  { %vm1506_vm12 = vcmp.le.f32.partialorder %v195_v15, 0.7853982  ;;  %v280_v48 = vsel %vm197_vm11, %v279_v32, %v278_v9  ;;  %v1513_v46 = vmul.f32 -2.0, %v158_v18  ;;  %v382_v38 = vxor.u32 2147483648, %v381_v5 }
  0x8c   :  { %v476_v57 = vor.u32 %v475_v54, %v474_v45  ;;  %v479_v50 = vshll.u32 %v478_v13, 23  ;;  %v1499_v41 = vshrl.u32 %v565_v11, 30  ;;  %vm300_vm13 = vcmp.lt.s32.totalorder %v1279_v0, 0 }
  0x8d   :  { %v283_v4 = vsel %vm1506_vm12, %v1277_v62, %v280_v48  ;;  %1177 = vrsqrt.f32 %v1502_v49  ;;  %vm1523_vm14 = vcmp.le.f32.partialorder %v298_v28, 0.7853982  ;;  %v383_v40 = vsel %vm300_vm13, %v382_v38, %v381_v5 }
  0x8e   :  { %v480_v39 = vor.u32 4788187, %v479_v50  ;;  %v483_v26 = vcvt.s32.f32 %v476_v57  ;;  %v567_v31 = vshll.u32 %v1499_v41, 30  ;;  %1179 = vrsqrt.f32 %v1513_v46 }
  0x8f   :  { %1181 = vcosq.f32 %v283_v4  ;;  %v281_v14 = vsub.s32 4, %v1363_v25  ;;  %vm403_vm15 = vcmp.lt.s32.totalorder %v1293_v27, 0  ;;  %v386_v23 = vsel %vm1523_vm14, %v1279_v0, %v383_v40 }
  0x90   :  { %v481_v43 = vand.u32 2147483647, %v480_v39  ;;  %v568_v61 = vsub.s32 %v564_v19, %v567_v31  ;;  %1183 = vsinq.f32 %v283_v4  ;;  %vm1536_vm0 = vcmp.le.f32.partialorder %v401_v6, 0.7853982 }
  0x91   :  { %v282_v21 = vsel %vm197_vm11, %v281_v14, %v1363_v25  ;;  %v384_v3 = vsub.s32 4, %v1409_v16  ;;  %1185 = vcosq.f32 %v386_v23  ;;  %v560_v6 = vadd.s32 %v1483_v59, %v1480_v2 }
  0x92   :  { %v484_v17 = vmul.f32 %v483_v26, %v481_v43  ;;  %v570_v15 = vsub.s32 0, %v568_v61  ;;  %1187 = vsinq.f32 %v386_v23  ;;  %vm165_vm2 = vcmp.eq.f32.partialorder %v1493_v52, inf }
  0x93   :  { %v284_v30 = vsel %vm1506_vm12, 0, %v282_v21  ;;  %vm172_vm3 = vcmp.eq.f32.partialorder %v1495_v22, inf  ;;  %v385_v2 = vsel %vm300_vm13, %v384_v3, %v1409_v16  ;;  %v487_v59 = vsub.s32 4, %v1456_v56 }
  0x94   :  { %v485_v55 = vxor.u32 2147483648, %v484_v17  ;;  %v1121_v60 = vmin.u32 %v570_v15, %v568_v61  ;;  %vm167_vm4 = vcmp.eq.f32.partialorder %v1493_v52, 0.0  ;;  %v168_v37 = vand.u32 2147483648, %v1493_v52 }
  0x95   :  { %vm506_vm5 = vcmp.lt.s32.totalorder %v1379_v53, 0  ;;  %v708_v54 = vadd.s32 3, %v284_v30  ;;  %v175_v20 = vand.u32 2147483648, %v1495_v22  ;;  %v387_v16 = vsel %vm1523_vm14, 0, %v385_v2 }
  0x96   :  { %v572_v47 = vclz %v1121_v60  ;;  %v486_v24 = vsel %vm403_vm15, %v485_v55, %v484_v17  ;;  %v1174_v10 = vpop.eup %1173  ;;  %vm1569_vm6 = vcmp.le.f32.partialorder %v504_v12, 0.7853982  ;;  %vm174_vm7 = vcmp.eq.f32.partialorder %v1495_v22, 0.0 }
  0x97   :  { %v1176_v7 = vpop.eup %1175  ;;  %v489_v33 = vsel %vm1536_vm0, %v1293_v27, %v486_v24  ;;  %v164_v45 = vmul.f32 %v1174_v10, %v1493_v52  ;;  %v288_v18 = vand.u32 3, %v284_v30  ;;  %v1580_v39 = vand.u32 3, %v387_v16 }
  0x98   :  { %v1122_v44 = vadd.s32 4294967294, %v572_v47  ;;  %v171_v36 = vmul.f32 %v1176_v7, %v1495_v22  ;;  %1189 = vcosq.f32 %v489_v33  ;;  %v488_v12 = vsel %vm403_vm15, %v487_v59, %v1456_v56 }
  0x99   :  { %1191 = vsinq.f32 %v489_v33  ;;  %v166_v32 = vsel %vm165_vm2, %v1493_v52, %v164_v45  ;;  %v182_v48 = vand.u32 2147483648, %v1502_v49  ;;  %v709_v31 = vand.u32 3, %v708_v54 }
  0x9a   :  { %vm1123_vm1 = vcmp.lt.s32.totalorder %v1122_v44, 0  ;;  %v1178_v58 = vpop.eup %1177  ;;  %v173_v11 = vsel %vm172_vm3, %v1495_v22, %v171_v36  ;;  %v812_v38 = vadd.s32 3, %v387_v16  ;;  %v1591_v22 = vsel %vm167_vm4, %v168_v37, %v166_v32 }
  0x9b   :  { %v575_v8 = vsel %vm1123_vm1, 0, %v1122_v44  ;;  %v1180_v13 = vpop.eup %1179  ;;  %v1586_v34 = vmul.f32 %v1178_v58, %v1502_v49  ;;  %v1593_v17 = vsel %vm174_vm7, %v175_v20, %v173_v11  ;;  %vm287_vm8 = vweird.f32 %v1277_v62 }
  0x9c   :  { %v576_v25 = vsub.s32 32, %v575_v8  ;;  %v577_v42 = vshll.u32 %v568_v61, %v575_v8  ;;  %v580_v63 = vsub.s32 4294967266, %v575_v8  ;;  %v1182_v51 = vpop.eup %1181  ;;  %v1596_v61 = vmul.f32 %v1180_v13, %v1513_v46 }
  0x9d   :  { %v1184_v5 = vpop.eup %1183  ;;  %vm289_vm9 = vcmp.lt.s32.totalorder %v288_v18, 2  ;;  %v294_v15 = vxor.u32 2147483648, %v1182_v51  ;;  %v490_v29 = vsel %vm1536_vm0, 0, %v488_v12  ;;  %vm290_vm10 = vcmp.eq.s32.totalorder %v288_v18, 0 }
  0x9e   :  { %v578_v35 = vshrl.u32 %v560_v6, %v576_v25  ;;  %v581_v9 = vadd.s32 127, %v580_v63  ;;  %v291_v56 = vxor.u32 2147483648, %v1184_v5  ;;  %v1186_v40 = vpop.eup %1185  ;;  %vm293_vm11 = vcmp.eq.s32.totalorder %v288_v18, 2 }
  0x9f   :  { %vm393_vm12 = vcmp.eq.s32.totalorder %v1580_v39, 0  ;;  %v1188_v55 = vpop.eup %1187  ;;  %vm179_vm13 = vcmp.eq.f32.partialorder %v1502_v49, inf  ;;  %v590_v60 = vsub.s32 4, %v1499_v41  ;;  %vm711_vm14 = vcmp.eq.s32.totalorder %v709_v31, 0 }
  0xa0   :  { %v579_v57 = vor.u32 %v578_v35, %v577_v42  ;;  %v582_v50 = vshll.u32 %v581_v9, 23  ;;  %vm714_vm15 = vcmp.eq.s32.totalorder %v709_v31, 2  ;;  %v813_v14 = vand.u32 3, %v812_v38 }
  0xa1   :  { %vm396_vm1 = vcmp.eq.s32.totalorder %v1580_v39, 2  ;;  %v494_v23 = vand.u32 3, %v490_v29  ;;  %v916_v28 = vadd.s32 3, %v490_v29  ;;  %v292_v24 = vsel %vm290_vm10, %v1182_v51, %v291_v56 }
  0xa2   :  { %v583_v26 = vor.u32 4788187, %v582_v50  ;;  %v586_v43 = vcvt.s32.f32 %v579_v57  ;;  %v295_v44 = vsel %vm293_vm11, %v294_v15, %v1184_v5  ;;  %vm390_vm0 = vweird.f32 %v1279_v0 }
  0xa3   :  { %v397_v10 = vxor.u32 2147483648, %v1186_v40  ;;  %vm710_vm2 = vcmp.lt.s32.totalorder %v709_v31, 2  ;;  %v394_v21 = vxor.u32 2147483648, %v1188_v55  ;;  %v713_v7 = vsel %vm711_vm14, %v1182_v51, %v291_v56 }
  0xa4   :  { %v584_v4 = vand.u32 2147483647, %v583_v26  ;;  %v716_v6 = vsel %vm714_vm15, %v294_v15, %v1184_v5  ;;  %v591_v8 = vsel %vm506_vm5, %v590_v60, %v1499_v41  ;;  %vm815_vm3 = vcmp.eq.s32.totalorder %v813_v14, 0 }
  0xa5   :  { %v1190_v33 = vpop.eup %1189  ;;  %vm818_vm4 = vcmp.eq.s32.totalorder %v813_v14, 2  ;;  %vm181_vm7 = vcmp.eq.f32.partialorder %v1502_v49, 0.0  ;;  %v296_v42 = vsel %vm289_vm9, %v292_v24, %v295_v44  ;;  %vm392_vm10 = vcmp.lt.s32.totalorder %v1580_v39, 2 }
  0xa6   :  { %v587_v52 = vmul.f32 %v586_v43, %v584_v4  ;;  %v1192_v25 = vpop.eup %1191  ;;  %v917_v63 = vand.u32 3, %v916_v28  ;;  %v398_v45 = vsel %vm396_vm1, %v397_v10, %v1188_v55  ;;  %v717_v41 = vsel %vm710_vm2, %v713_v7, %v716_v6 }
  0xa7   :  { %v395_v36 = vsel %vm393_vm12, %v1186_v40, %v394_v21  ;;  %v593_v2 = vsel %vm1569_vm6, 0, %v591_v8  ;;  %v817_v59 = vsel %vm815_vm3, %v1186_v40, %v394_v21  ;;  %v820_v35 = vsel %vm818_vm4, %v397_v10, %v1188_v55 }
  0xa8   :  { %v588_v47 = vxor.u32 2147483648, %v587_v52  ;;  %vm496_vm9 = vcmp.eq.s32.totalorder %v494_v23, 0  ;;  %v497_v9 = vxor.u32 2147483648, %v1192_v25  ;;  %v500_v58 = vxor.u32 2147483648, %v1190_v33 }
  0xa9   :  { %v297_v37 = vsel %vm287_vm8, nan, %v296_v42  ;;  %vm499_vm11 = vcmp.eq.s32.totalorder %v494_v23, 2  ;;  %vm919_vm14 = vcmp.eq.s32.totalorder %v917_v63, 0  ;;  %vm922_vm15 = vcmp.eq.s32.totalorder %v917_v63, 2 }
  0xaa   :  { %v589_v3 = vsel %vm506_vm5, %v588_v47, %v587_v52  ;;  %vm814_vm5 = vcmp.lt.s32.totalorder %v813_v14, 2  ;;  %v399_v54 = vsel %vm392_vm10, %v395_v36, %v398_v45  ;;  %v718_v13 = vsel %vm287_vm8, nan, %v717_v41 }
  0xab   :  { %v592_v30 = vsel %vm1569_vm6, %v1379_v53, %v589_v3  ;;  %v821_v20 = vsel %vm814_vm5, %v817_v59, %v820_v35  ;;  %v1020_v16 = vadd.s32 3, %v593_v2  ;;  %v180_v19 = vsel %vm179_vm13, %v1502_v49, %v1586_v34 }
  0xac   :  { %1193 = vcosq.f32 %v592_v30  ;;  %vm495_vm6 = vcmp.lt.s32.totalorder %v494_v23, 2  ;;  %vm918_vm12 = vcmp.lt.s32.totalorder %v917_v63, 2  ;;  %v1248_v57 = vmov 1983009808  }
  0xad   :  { %1195 = vsinq.f32 %v592_v30  ;;  %v1047_v50 = vunpack.c.l.s4 %v1248_v57  ;;  %v498_v51 = vsel %vm496_vm9, %v1190_v33, %v497_v9  ;;  %v501_v32 = vsel %vm499_vm11, %v500_v58, %v1192_v25 }
  0xae   :  { %v921_v11 = vsel %vm919_vm14, %v1190_v33, %v497_v9  ;;  %v924_v18 = vsel %vm922_vm15, %v500_v58, %v1192_v25  ;;  %v400_v62 = vsel %vm390_vm0, nan, %v399_v54  ;;  %v607_v5 = vmul.f32 %v297_v37, %v1591_v22  ;;  %v1039_v58 = vld [vmem:[#allocation3] sm:$0xff]  ;;  %v1064_v37 = vld [vmem:[#allocation3 + $0x8] sm:$0xff] }
  0xaf   :  { %v822_v39 = vsel %vm390_vm0, nan, %v821_v20  ;;  %v1031_v12 = vmul.f32 %v718_v13, %v1591_v22  ;;  %vm186_vm8 = vcmp.eq.f32.partialorder %v1513_v46, inf  ;;  %vm493_vm13 = vweird.f32 %v1293_v27 }
  0xb0   :  { %v597_v26 = vand.u32 3, %v593_v2  ;;  %v1021_v43 = vand.u32 3, %v1020_v16  ;;  %vm188_vm1 = vcmp.eq.f32.partialorder %v1513_v46, 0.0  ;;  %v502_v34 = vsel %vm495_vm6, %v498_v51, %v501_v32 }
  0xb1   :  { %vm596_vm2 = vweird.f32 %v1379_v53  ;;  %v925_v31 = vsel %vm918_vm12, %v921_v11, %v924_v18  ;;  %v183_v0 = vsel %vm181_vm7, %v182_v48, %v180_v19  ;;  %v189_v38 = vand.u32 2147483648, %v1513_v46 }
  0xb2   :  { %v608_v22 = vmul.f32 %v400_v62, %v1593_v17  ;;  %v1032_v4 = vmul.f32 %v822_v39, %v1593_v17  ;;  %v187_v56 = vsel %vm186_vm8, %v1513_v46, %v1596_v61  ;;  %v611_v15 = vmul.f32 0.1, %v607_v5 }
  0xb3   :  { %v1035_v29 = vmul.f32 0.1, %v1031_v12  ;;  %v1048_v40 = vunpack.c.0.s8 %v1047_v50  ;;  %v503_v55 = vsel %vm493_vm13, nan, %v502_v34  ;;  %vm602_vm0 = vcmp.eq.s32.totalorder %v597_v26, 2 }
  0xb4   :  { %v926_v49 = vsel %vm493_vm13, nan, %v925_v31  ;;  %vm1026_vm3 = vcmp.eq.s32.totalorder %v1021_v43, 2  ;;  %vm598_vm4 = vcmp.lt.s32.totalorder %v597_v26, 2  ;;  %vm599_vm7 = vcmp.eq.s32.totalorder %v597_v26, 0 }
  0xb5   :  { %vm1023_vm10 = vcmp.eq.s32.totalorder %v1021_v43, 0  ;;  %v612_v14 = vmul.f32 0.1, %v608_v22  ;;  %vm1022_vm5 = vcmp.lt.s32.totalorder %v1021_v43, 2  ;;  %v1036_v61 = vmul.f32 0.1, %v1032_v4 }
  0xb6   :  { %v609_v47 = vmul.f32 %v503_v55, %v183_v0  ;;  %v1033_v24 = vmul.f32 %v926_v49, %v183_v0  ;;  %v190_v44 = vsel %vm188_vm1, %v189_v38, %v187_v56  ;;  %v1051_v7 = vsub.s32 %v1048_v40, %v1271_v1 }
  0xb7   :  { %v1044_v8 = vcombine.low %v611_v15, %v612_v14  ;;  %v1069_v30 = vcombine.low %v1035_v29, %v1036_v61 }
  0xb8   :  { %v613_v42 = vmul.f32 0.1, %v609_v47  ;;  %v1037_v45 = vmul.f32 0.1, %v1033_v24 }
  0xb9   :  { %v1194_v52 = vpop.eup %1193  ;;  %v1052_v2 = vrot.slane %v1044_v8, %v1051_v7  ;;  %v1077_v35 = vrot.slane %v1069_v30, %v1051_v7 }
  0xba   :  { %v1196_v48 = vpop.eup %1195  ;;  %v603_v60 = vxor.u32 2147483648, %v1194_v52 }
  0xbb   :  { %v600_v17 = vxor.u32 2147483648, %v1196_v48 }
  0xbc   :  { %v604_v23 = vsel %vm602_vm0, %v603_v60, %v1196_v48  ;;  %v1028_v28 = vsel %vm1026_vm3, %v603_v60, %v1196_v48 }
  0xbd   :  { %v601_v10 = vsel %vm599_vm7, %v1194_v52, %v600_v17  ;;  %v1025_v27 = vsel %vm1023_vm10, %v1194_v52, %v600_v17 }
  0xbe   :  { %v605_v21 = vsel %vm598_vm4, %v601_v10, %v604_v23  ;;  %v1029_v3 = vsel %vm1022_vm5, %v1025_v27, %v1028_v28 }
  0xbf   :  { %v606_v6 = vsel %vm596_vm2, nan, %v605_v21  ;;  %v1030_v33 = vsel %vm596_vm2, nan, %v1029_v3 }
  0xc0   :  { %v610_v25 = vmul.f32 %v606_v6, %v190_v44  ;;  %v1034_v63 = vmul.f32 %v1030_v33, %v190_v44 }
  0xc2   :  { %v614_v46 = vmul.f32 0.1, %v610_v25  ;;  %v1038_v41 = vmul.f32 0.1, %v1034_v63 }
  0xc4   :  { %v1045_v36 = vcombine.low %v613_v42, %v614_v46  ;;  %v1070_v59 = vcombine.low %v1037_v45, %v1038_v41 }
  0xc6   :  { %v1059_v9 = vrot.slane %v1045_v36, %v1051_v7  ;;  %v1084_v1 = vrot.slane %v1070_v59, %v1051_v7 }
  0xc8   :  { %v1060_v53 = vcombine.low %v1052_v2, %v1059_v9  ;;  %v1085_v54 = vcombine.low %v1077_v35, %v1084_v1 }
  0xca   :  { %v1062_v13 = vadd.f32 %v1060_v53, %v1039_v58  ;;  %v1087_v20 = vadd.f32 %v1085_v54, %v1064_v37 }
  0xcc   :  { %1063 = vst [vmem:[#allocation6] sm:$0xff] %v1062_v13  ;;  %1088 = vst [vmem:[#allocation6 + $0x8] sm:$0xff] %v1087_v20 }
  0xcd   :  { %1228 = shalt.err (!%p1225_p9)
}
  0xce   :  { %1098 = dma.vmem_to_hbm [thread:$0]  %s1096_s1, 256, %s1672_s2, [#allocation5]  }
  0xcf   :  { %1239 = dma.done.wait [#allocation5], 256  }
  0xd0   :  { %1240 = vsyncadd [#allocation5], 4294967040 }
  0xd1   :  { %1102 = vsyncpa [#allocation4], 1 }
  0xd2   :  { %1103 = vsyncpa [#allocation5], 1 }

</bundles_post_ra>
